<compile_context>
chip_gen: v7x
topology: tpu7x:2x2x1
jax: 0.10.0
libtpu: 0.0.40
codegen_flags: <defaults>
</compile_context>

<pallas_src>
import functools

import jax
import jax.numpy as jnp
from jax.experimental import pallas as pl
from jax.experimental.pallas import tpu as pltpu


def _round_up(x, m):
    return ((x + m - 1) // m) * m


def _focal_ce_partial_kernel(logits_ref, targets_ref, psum_ref, *, n_rows):
    """Per-tile partial sum of the per-row cross entropies.

    logits_ref:  (TILE_N, C) in input dtype, VMEM
    targets_ref: (TILE_N, 1) int32, VMEM
    psum_ref:    (1, 8, 128) f32, VMEM -- this tile's partial CE sum (broadcast)
    """
    i = pl.program_id(0)
    logits = logits_ref[...].astype(jnp.float32)          # cast after load (VPU)
    tgt = targets_ref[...]                                 # (TILE_N, 1) int32
    tn, c = logits.shape

    # Mask rows of the (possibly padded) last tile; also keeps exp/log finite
    # on whatever padded garbage the out-of-bounds rows contain.
    row_ids = jax.lax.broadcasted_iota(jnp.int32, (tn, 1), 0) + i * tn
    valid = row_ids < n_rows                                # (TILE_N, 1) bool
    logits = jnp.where(valid, logits, 0.0)                  # (TILE_N, C)

    # Per-row cross entropy: logsumexp(logits) - logits[target]
    col_ids = jax.lax.broadcasted_iota(jnp.int32, (tn, c), 1)
    onehot = (col_ids == tgt).astype(jnp.float32)           # (TILE_N, C)
    row_max = jnp.max(logits, axis=-1, keepdims=True)       # (TILE_N, 1)
    lse = row_max + jnp.log(
        jnp.sum(jnp.exp(logits - row_max), axis=-1, keepdims=True))
    tgt_logit = jnp.sum(logits * onehot, axis=-1, keepdims=True)
    ce_rows = jnp.where(valid, lse - tgt_logit, 0.0)         # zero padded rows

    # Lane-dense (8,128) store of this tile's partial sum (unmasked vst).
    psum_ref[...] = jnp.full(psum_ref.shape, jnp.sum(ce_rows), dtype=jnp.float32)


def focal_loss(logits, targets, gamma=2.0, tile_n=None):
    """logits: (N, C) float (any float dtype), targets: (N,) int -> scalar focal loss."""
    n, c = logits.shape
    targets2d = targets.astype(jnp.int32).reshape(n, 1)

    if tile_n is None:
        # ~4 MiB logits blocks: large enough to amortize the ~0.35us per-step
        # overhead, small enough that 2x double-buffered blocks stay well under
        # v7x's 64 MiB VMEM (and v5e's 16 MiB scoped default).
        itemsize = jnp.dtype(logits.dtype).itemsize
        target_block_bytes = 4 * 1024 * 1024
        tile_n = (target_block_bytes // max(c * itemsize, 1)) // 8 * 8
        tile_n = int(max(8, min(1024, tile_n)))
    tile_n = int(min(tile_n, _round_up(n, 8)))
    num_tiles = -(-n // tile_n)

    kernel = functools.partial(_focal_ce_partial_kernel, n_rows=n)
    partials = pl.pallas_call(
        kernel,
        out_shape=jax.ShapeDtypeStruct((num_tiles, 8, 128), jnp.float32),
        grid=(num_tiles,),
        in_specs=[
            pl.BlockSpec((tile_n, c), lambda i: (i, 0)),   # logits tile (full C width)
            pl.BlockSpec((tile_n, 1), lambda i: (i, 0)),   # targets tile
        ],
        out_specs=pl.BlockSpec((1, 8, 128), lambda i: (i, 0, 0)),
        compiler_params=pltpu.CompilerParams(
            dimension_semantics=("parallel",),             # per-tile partials -> no carry
            vmem_limit_bytes=32 * 1024 * 1024,
        ),
    )(logits, targets2d)

    # nn.CrossEntropyLoss default reduction='mean' (weight=None), then the
    # module's focal wrap on the *reduced* scalar CE, exactly like the PyTorch code.
    # TODO(synk): weighted mean (sum(w[t]*ce)/sum(w[t])) if weight is not None.
    ce = jnp.sum(partials[:, 0, 0]) / n
    pt = jnp.exp(-ce)
    one_minus_pt = 1.0 - pt
    g = float(gamma)
    if g == 2.0:
        modulator = one_minus_pt * one_minus_pt           # avoid pow -> log+exp
    else:
        modulator = one_minus_pt ** g
    return modulator * ce


def focal_loss_ref(logits, targets, gamma=2.0):
    # pure-JAX reference (matches torch CrossEntropyLoss mean + focal wrap)
    logits = logits.astype(jnp.float32)
    lse = jax.nn.logsumexp(logits, axis=-1)
    tgt_logit = jnp.take_along_axis(logits, targets[:, None], axis=-1)[:, 0]
    ce = jnp.mean(lse - tgt_logit)
    pt = jnp.exp(-ce)
    return (1.0 - pt) ** gamma * ce


if __name__ == "__main__":
    key = jax.random.PRNGKey(0)
    k1, k2 = jax.random.split(key)
    N, C = 8, 32  # small batch of logits over C classes
    logits = jax.random.normal(k1, (N, C), dtype=jnp.float32)
    targets = jax.random.randint(k2, (N,), 0, C, dtype=jnp.int32)

    out = focal_loss(logits, targets, gamma=2.0)
    out = jax.block_until_ready(out)

    ref = focal_loss_ref(logits, targets, gamma=2.0)
    assert jnp.allclose(out, ref, atol=1e-5, rtol=1e-5), (out, ref)

    # also exercise a multi-tile / padded-last-tile path with bf16 inputs
    N2, C2 = 300, 64
    k3, k4 = jax.random.split(k2)
    logits2 = jax.random.normal(k3, (N2, C2), dtype=jnp.bfloat16)
    targets2 = jax.random.randint(k4, (N2,), 0, C2, dtype=jnp.int32)
    out2 = jax.block_until_ready(focal_loss(logits2, targets2, gamma=2.0, tile_n=128))
    ref2 = focal_loss_ref(logits2, targets2, gamma=2.0)
    assert jnp.allclose(out2, ref2, atol=2e-2, rtol=2e-2), (out2, ref2)

    print("KERNEL_OK")
</pallas_src>

<mosaic_0001>
module attributes {stable_mosaic.version = 11 : i64} {
  func.func @_focal_ce_partial_kernel(%arg0: i32, %arg1: memref<8x32xf32, #tpu.memory_space<vmem>>, %arg2: memref<8x1xi32, #tpu.memory_space<vmem>>, %arg3: memref<1x8x128xf32, #tpu.memory_space<vmem>>) attributes {dimension_semantics = [#tpu.dimension_semantics<parallel>], iteration_bounds = array<i64: 1>, scalar_prefetch = 0 : i64, scratch_operands = 0 : i64, tpu.core_type = #tpu.core_type<tc>, window_params = [{transform_indices = @transform_0, window_bounds = array<i64: 8, 32>}, {transform_indices = @transform_1, window_bounds = array<i64: 8, 1>}, {transform_indices = @transform_2, window_bounds = array<i64: 1, 8, 128>}]} {
    %c0 = arith.constant 0 : index
    %c0_0 = arith.constant 0 : index
    %0 = vector.load %arg1[%c0, %c0_0] : memref<8x32xf32, #tpu.memory_space<vmem>>, vector<8x32xf32>
    %c0_1 = arith.constant 0 : index
    %c0_2 = arith.constant 0 : index
    %1 = vector.load %arg2[%c0_1, %c0_2] : memref<8x1xi32, #tpu.memory_space<vmem>>, vector<8x1xi32>
    %2 = tpu.iota {dimensions = array<i32: 0>} : vector<8x1xi32>
    %c8_i32 = arith.constant 8 : i32
    %3 = arith.muli %arg0, %c8_i32 : i32
    %4 = vector.broadcast %3 : i32 to vector<8x1xi32>
    %5 = arith.addi %2, %4 : vector<8x1xi32>
    %c8_i32_3 = arith.constant 8 : i32
    %6 = vector.broadcast %c8_i32_3 : i32 to vector<8x1xi32>
    %7 = arith.cmpi slt, %5, %6 : vector<8x1xi32>
    %cst = arith.constant 0.000000e+00 : f32
    %8 = vector.shape_cast %7 : vector<8x1xi1> to vector<8x1xi1>
    %9 = vector.broadcast %8 : vector<8x1xi1> to vector<8x32xi1>
    %10 = vector.broadcast %cst : f32 to vector<8x32xf32>
    %11 = arith.select %9, %0, %10 : vector<8x32xi1>, vector<8x32xf32>
    %12 = tpu.iota {dimensions = array<i32: 1>} : vector<8x32xi32>
    %13 = vector.broadcast %1 : vector<8x1xi32> to vector<8x32xi32>
    %14 = arith.cmpi eq, %12, %13 : vector<8x32xi32>
    %15 = arith.extui %14 : vector<8x32xi1> to vector<8x32xi32>
    %16 = arith.sitofp %15 : vector<8x32xi32> to vector<8x32xf32>
    %cst_4 = arith.constant dense<0xFF800000> : vector<8xf32>
    %17 = vector.multi_reduction <maximumf>, %11, %cst_4 [1] : vector<8x32xf32> to vector<8xf32>
    %18 = vector.shape_cast %17 : vector<8xf32> to vector<8x1xf32>
    %19 = vector.broadcast %18 : vector<8x1xf32> to vector<8x32xf32>
    %20 = arith.subf %11, %19 : vector<8x32xf32>
    %21 = math.exp %20 : vector<8x32xf32>
    %cst_5 = arith.constant dense<0.000000e+00> : vector<8xf32>
    %22 = vector.multi_reduction <add>, %21, %cst_5 [1] : vector<8x32xf32> to vector<8xf32>
    %23 = vector.shape_cast %22 : vector<8xf32> to vector<8x1xf32>
    %24 = math.log %23 : vector<8x1xf32>
    %25 = arith.addf %18, %24 : vector<8x1xf32>
    %26 = arith.mulf %11, %16 : vector<8x32xf32>
    %cst_6 = arith.constant dense<0.000000e+00> : vector<8xf32>
    %27 = vector.multi_reduction <add>, %26, %cst_6 [1] : vector<8x32xf32> to vector<8xf32>
    %28 = vector.shape_cast %27 : vector<8xf32> to vector<8x1xf32>
    %29 = arith.subf %25, %28 : vector<8x1xf32>
    %cst_7 = arith.constant 0.000000e+00 : f32
    %30 = vector.broadcast %cst_7 : f32 to vector<8x1xf32>
    %31 = arith.select %7, %29, %30 : vector<8x1xi1>, vector<8x1xf32>
    %32 = vector.shape_cast %31 : vector<8x1xf32> to vector<1x8x1xf32>
    %cst_8 = arith.constant dense<0.000000e+00> : vector<1xf32>
    %33 = vector.multi_reduction <add>, %32, %cst_8 [1, 2] : vector<1x8x1xf32> to vector<1xf32>
    %34 = vector.shape_cast %33 : vector<1xf32> to vector<1x1x1xf32>
    %35 = vector.extract %34[0, 0, 0] : f32 from vector<1x1x1xf32>
    %36 = vector.broadcast %35 : f32 to vector<1x8x128xf32>
    %c0_9 = arith.constant 0 : index
    %c0_10 = arith.constant 0 : index
    %c0_11 = arith.constant 0 : index
    %37 = vector.load %arg3[%c0_9, %c0_10, %c0_11] : memref<1x8x128xf32, #tpu.memory_space<vmem>>, vector<1x8x128xf32>
    tpu.vector_store %arg3[%c0_9, %c0_10, %c0_11], %36 {strides = array<i32>} : memref<1x8x128xf32, #tpu.memory_space<vmem>>, vector<1x8x128xf32>,
    return
  }
  func.func @transform_0(%arg0: i32) -> (i32, i32) {
    %c0_i32 = arith.constant 0 : i32
    %c0_i32_0 = arith.constant 0 : i32
    return %arg0, %c0_i32 : i32, i32
  }
  func.func @transform_1(%arg0: i32) -> (i32, i32) {
    %c0_i32 = arith.constant 0 : i32
    %c0_i32_0 = arith.constant 0 : i32
    return %arg0, %c0_i32 : i32, i32
  }
  func.func @transform_2(%arg0: i32) -> (i32, i32, i32) {
    %c0_i32 = arith.constant 0 : i32
    %c0_i32_0 = arith.constant 0 : i32
    %c0_i32_1 = arith.constant 0 : i32
    return %arg0, %c0_i32, %c0_i32_0 : i32, i32, i32
  }
}

</mosaic_0001>

<bundles_post_ra>
// kernel: tpu_custom_call.1
= control target key start
LH: loop header
LB: loop body
LE: loop exit
PB: predicated region body
PF: predicated region fallthrough
CT: control target
= control target key end

     0   :  { %vm31_vm0 = vcmask 261120   ;;  %s151_s0 = inlined_call_operand.vmem [shape: f32[8,32], index: 0, kind: input, shape index: {}]   ;;  %s152_s1 = inlined_call_operand.vmem [shape: s32[8,1], index: 1, kind: input, shape index: {}]   ;;  %s153_s2 = inlined_call_operand.hbm [shape: f32[1,8,128], index: 2, kind: output, shape index: {}]  }
   0x1   :  { %v12_v0 = vld [vmem:[%s151_s0] sm:$0xff] }
   0x2   :  { %7 = vsyncpa [#allocation3], 0  ;;  %v32_v1 = vsel %vm31_vm0, %v12_v0, -inf  ;;  %v112_v2 = vmov 0   ;;  %v13_v3 = vld [vmem:[%s152_s1] sm:$0xff]  ;;  %v23_v6 = vlaneseq  ;;  %v113_v10 = vmov 0.0  }
   0x3   :  { %83 = vset.pattern.permute.xlu0 %v112_v2  ;;  %vm50_vm2 = vcmask 7168   ;;  %s114_s0 = smov [#allocation2]  }
   0x4   :  { %33 = vmax.xlane.f32.xlu0 %v32_v1  ;;  %v24_v8 = vand.u32 127, %v23_v6  ;;  %s69_s1 = sshll.u32 %s114_s0, 4  ;;  %s70_s1 = int_to_ptr.vmem [resolvable:$true] %s69_s1 }
   0x5   :  { %s88_s14 = scalar_lea.vmem %s70_s1, 128  ;;  %p93_p1 = scmp.lt.s32.totalorder %s70_s1, %s70_s1 }
   0x6   :  { %p89_p0 = scmp.ne.s32.totalorder %s70_s1, %s88_s14  ;;  %p94_p2 = scmp.lt.s32.totalorder %s88_s14, %s88_s14 }
   0x8   :  { %p95_p3 = por %p94_p2, %p93_p1 }
   0xa   :  { %p96_p4 = pnand %p95_p3, %p89_p0 }
  0x1a   :  { %26 = vperm.xlu0 %83, %v13_v3  }
  0x91   :  { %v34_v4 = vpop.xlane.xlu0 %33 }
  0x92   :  { %v35_v5 = vsub.f32 %v12_v0, %v34_v4 }
  0x94   :  { %v36_v7 = vmul.f32 1.442695, %v35_v5 }
  0x96   :  { %84 = vpow2.f32 %v36_v7 }
  0x99   :  { %v27_v9 = vpop.permute.xlu0 %26 }
  0x9a   :  { %vm28_vm1 = vcmp.eq.s32.totalorder %v24_v8, %v27_v9 }
  0x9b   :  { %v77_v11 = vsel %vm28_vm1, 1.0, %v113_v10 }
  0x9c   :  { %v44_v12 = vmul.f32 %v77_v11, %v12_v0 }
  0x9e   :  { %v45_v15 = vsel %vm31_vm0, %v44_v12, 0.0 }
  0xa0   :  { %v85_v13 = vpop.eup %84 }
  0xa1   :  { %v38_v14 = vsel %vm31_vm0, %v85_v13, 0.0 }
  0xa2   :  { %39 = vadd.xlane.f32.xlu1 %v38_v14 }
  0xa6   :  { %46 = vadd.xlane.f32.xlu1 %v45_v15 }
 0x12f   :  { %v40_v16 = vpop.xlane.xlu1 %39 }
 0x130   :  { %86 = vlog2.f32 %v40_v16 }
 0x133   :  { %v47_v19 = vpop.xlane.xlu1 %46 }
 0x13a   :  { %v87_v17 = vpop.eup %86 }
 0x13b   :  { %v42_v18 = vmul.f32 0.6931472, %v87_v17 }
 0x13d   :  { %v43_v20 = vadd.f32 %v42_v18, %v34_v4 }
 0x13f   :  { %v48_v21 = vsub.f32 %v43_v20, %v47_v19 }
 0x141   :  { %v51_v22 = vsel %vm50_vm2, %v48_v21, 0.0 }
 0x142   :  { %52 = vadd.xlane.f32.xlu1 %v51_v22 }
 0x1cf   :  { %v53_v23 = vpop.xlane.xlu1 %52 }
 0x1d0   :  { %v54_v24 = vrot.slane %v53_v23, 4 }
 0x1d2   :  { %v55_v25 = vadd.f32 %v54_v24, %v53_v23 }
 0x1d4   :  { %v56_v26 = vrot.slane %v55_v25, 2 }
 0x1d6   :  { %v57_v27 = vadd.f32 %v56_v26, %v55_v25 }
 0x1d8   :  { %v58_v28 = vrot.slane %v57_v27, 1 }
 0x1da   :  { %v59_v29 = vadd.f32 %v58_v28, %v57_v27 }
 0x1dc   :  { %78 = vpush %v59_v29 }
 0x20d   :  { %s79_s13 = spop %78 }
 0x20e   :  { %v61_v30 = vstv %s79_s13 }
 0x20f   :  { %62 = vst [vmem:[#allocation2] sm:$0xff] %v61_v30 }
 0x210   :  { %99 = shalt.err (!%p96_p4)
}
 0x211   :  { %s100_s17 = scalar_lea.hbm %s153_s2, 128 }
 0x212   :  { %p101_p5 = scmp.ne.s32.totalorder %s153_s2, %s100_s17  ;;  %p104_p6 = scmp.lt.u32.totalorder %s100_s17, %s153_s2 }
 0x214   :  { %p106_p7 = pnand %p104_p6, %p101_p5 }
 0x216   :  { %109 = shalt.err (!%p106_p7)
}
 0x217   :  { %72 = dma.vmem_to_hbm [thread:$0]  %s70_s1, 128, %s153_s2, [#allocation3]  }
 0x218   :  { %110 = dma.done.wait [#allocation3], 128  }
 0x219   :  { %111 = vsyncadd [#allocation3], 4294967168 }
 0x21a   :  { %76 = vsyncpa [#allocation3], 1 }

</bundles_post_ra>
